<compile_context>
chip_gen: v7x
topology: tpu7x:2x2x1
jax: 0.10.0
libtpu: 0.0.40
codegen_flags: <defaults>
</compile_context>

<pallas_src>
import functools
import math

import jax
import jax.numpy as jnp
from jax.experimental import pallas as pl
from jax.experimental.pallas import tpu as pltpu


def _round_up(x, m):
    return (x + m - 1) // m * m


def _downsample_conv_kernel(xm_ref, xh_ref, w_ref, o_ref, xbuf_ref):
    """One (batch, row-tile, cout-tile) grid step: 9-tap conv accumulate + ReLU.

    xm_ref  : (4, tho, Wq, Cin)    main block of the phase-split padded input
    xh_ref  : (4, 1,   Wq, Cin)    one-row halo block (row-pair index (i+1)*tho)
    w_ref   : (9, Cin, tn)         per-tap weight matrices (Cout tile, lane-padded)
    o_ref   : (tho*Wo, tn)         output tile (flattened rows, lane-dense Cout)
    xbuf_ref: (4, tho+1, Wq, Cin)  VMEM scratch holding the main+halo working set
    """
    _, tho, wq, cin = xm_ref.shape
    wo = wq - 1
    tn = o_ref.shape[-1]

    # Assemble the (tho+1)-row working set once; all 9 taps read from it (VMEM-only copies).
    xbuf_ref[:, 0:tho, :, :] = xm_ref[...]
    xbuf_ref[:, tho:tho + 1, :, :] = xh_ref[...]

    acc = jnp.zeros((tho * wo, tn), jnp.float32)
    for kh in range(3):
        dh, a = kh // 2, kh % 2          # padded input row = 2*(ho + dh) + a
        for kw in range(3):
            dw, b = kw // 2, kw % 2      # padded input col = 2*(wo + dw) + b
            patch = xbuf_ref[2 * a + b, dh:dh + tho, dw:dw + wo, :]   # (tho, Wo, Cin)
            patch = patch.reshape(tho * wo, cin)
            acc = acc + jnp.dot(patch, w_ref[kh * 3 + kw],
                                preferred_element_type=jnp.float32)
    o_ref[...] = jnp.maximum(acc, 0.0).astype(o_ref.dtype)


def downsample_conv(x_nchw, weight, *, stride=2, padding=1, compute_dtype=None,
                    nchw_output=True, m_target=1024,
                    vmem_block_budget=4 * 1024 * 1024):
    """relu(conv2d(x, weight, stride=2, padding=1, bias=None)) == DownsampleConv.forward."""
    N, Cin, H, W = x_nchw.shape
    Cout, Cin_w, KH, KW = weight.shape
    assert Cin == Cin_w and KH == 3 and KW == 3 and stride == 2

    Ho = (H + 2 * padding - KH) // stride + 1
    Wo = (W + 2 * padding - KW) // stride + 1
    Wq = Wo + 1                                   # column "pairs" in the phase-split layout

    out_dtype = x_nchw.dtype
    cdt = out_dtype if compute_dtype is None else compute_dtype
    itemsize = jnp.dtype(cdt).itemsize

    # ---- tile sizes -------------------------------------------------------------------
    Coutp = max(128, _round_up(Cout, 128))        # lane-dense output last dim
    tn = 256 if Coutp % 256 == 0 else 128         # Cout tile (v6e/v7x MXU is 256 wide)
    # Row-pairs per tile: target ~m_target matmul rows, capped by a per-block VMEM budget.
    # Budget uses the physically (sublane, lane)-padded footprint so tiny Cin can't blow VMEM.
    row_bytes = 4 * _round_up(Wq, 16) * _round_up(Cin, 128) * itemsize
    tho = min(max(1, m_target // max(Wo, 1)),
              max(1, vmem_block_budget // row_bytes),
              Ho)
    g = 8 // math.gcd(Wo, 8)                      # make tho*Wo a multiple of 8 sublanes
    tho = max(g, (tho // g) * g)
    Ho_pad = _round_up(Ho, tho)
    n_i = Ho_pad // tho
    Hq = Ho_pad + 1                               # row-pairs in the phase-split layout

    # ---- glue: NCHW -> phase-split padded NHWC (~1x pass, replaces the 9x im2col) ------
    pad_bottom = 2 * Hq - H - padding
    pad_right = 2 * Wq - W - padding
    assert pad_bottom >= 0 and pad_right >= 0
    xh = jnp.transpose(x_nchw, (0, 2, 3, 1)).astype(cdt)                     # NHWC
    xp = jnp.pad(xh, ((0, 0), (padding, pad_bottom), (padding, pad_right), (0, 0)))
    # xq[n, 2*a + b, r, c, ci] == xp[n, 2*r + a, 2*c + b, ci]
    xq = (xp.reshape(N, Hq, 2, Wq, 2, Cin)
            .transpose(0, 2, 4, 1, 3, 5)
            .reshape(N, 4, Hq, Wq, Cin))

    # Per-tap weight matrices: w_taps[kh*3+kw, ci, co] = weight[co, ci, kh, kw]; Cout padded.
    w_taps = jnp.transpose(weight, (2, 3, 1, 0)).reshape(KH * KW, Cin, Cout).astype(cdt)
    w_taps = jnp.pad(w_taps, ((0, 0), (0, 0), (0, Coutp - Cout)))

    grid = (N, n_i, Coutp // tn)
    cost = pl.CostEstimate(
        flops=2 * N * Ho * Wo * KH * KW * Cin * Cout,
        transcendentals=0,
        bytes_accessed=(xq.size * itemsize + w_taps.size * itemsize
                        + N * Ho_pad * Wo * Coutp * jnp.dtype(out_dtype).itemsize))

    out_flat = pl.pallas_call(
        _downsample_conv_kernel,
        out_shape=jax.ShapeDtypeStruct((N, Ho_pad * Wo, Coutp), out_dtype),
        grid=grid,
        in_specs=[
            # main row-pair block [i*tho, (i+1)*tho)
            pl.BlockSpec((None, 4, tho, Wq, Cin), lambda n, i, j: (n, 0, i, 0, 0)),
            # one-row halo block at row-pair (i+1)*tho (block size 1 => element index)
            pl.BlockSpec((None, 4, 1, Wq, Cin),
                         lambda n, i, j: (n, 0, (i + 1) * tho, 0, 0)),
            # all 9 taps of the j-th Cout tile (index constant over n, i within a j)
            pl.BlockSpec((KH * KW, Cin, tn), lambda n, i, j: (0, 0, j)),
        ],
        out_specs=pl.BlockSpec((None, tho * Wo, tn), lambda n, i, j: (n, i, j)),
        scratch_shapes=[pltpu.VMEM((4, tho + 1, Wq, Cin), cdt)],
        compiler_params=pltpu.CompilerParams(
            dimension_semantics=("parallel", "parallel", "arbitrary"),
            vmem_limit_bytes=32 * 1024 * 1024),
        cost_estimate=cost,
    )(xq, xq, w_taps)

    out = out_flat.reshape(N, Ho_pad, Wo, Coutp)[:, :Ho, :, :Cout]           # NHWC
    if not nchw_output:
        return out
    # TODO(synk): if the downstream consumer can take NHWC, pass nchw_output=False and skip
    # this extra HBM transpose pass.
    return jnp.transpose(out, (0, 3, 1, 2))                                  # NCHW


if __name__ == "__main__":
    key = jax.random.PRNGKey(0)
    kx, kw = jax.random.split(key)

    N, Cin, H, W = 2, 4, 16, 16
    Cout, KH, KW = 8, 3, 3

    x = jax.random.normal(kx, (N, Cin, H, W), dtype=jnp.float32)
    # Deterministic Kaiming-style init for the Conv2d weight (bias=False in the module).
    fan_in = Cin * KH * KW
    weight = jax.random.normal(kw, (Cout, Cin, KH, KW), dtype=jnp.float32) * (2.0 / fan_in) ** 0.5

    fwd = jax.jit(downsample_conv)
    y = jax.block_until_ready(fwd(x, weight))

    # Reference: XLA's native conv + ReLU.
    ref = jnp.maximum(jax.lax.conv_general_dilated(
        x, weight, window_strides=(2, 2), padding=((1, 1), (1, 1)),
        dimension_numbers=("NCHW", "OIHW", "NCHW")), 0.0)
    assert y.shape == (N, Cout, H // 2, W // 2)
    assert jnp.allclose(y, ref, atol=1e-3, rtol=1e-3)

    # bf16-operand fast path (v6e/v7x MXU), checked against a bf16-operand reference.
    fwd_bf16 = jax.jit(functools.partial(downsample_conv, compute_dtype=jnp.bfloat16))
    y_bf = jax.block_until_ready(fwd_bf16(x, weight))
    ref_bf = jnp.maximum(jax.lax.conv_general_dilated(
        x.astype(jnp.bfloat16), weight.astype(jnp.bfloat16), window_strides=(2, 2),
        padding=((1, 1), (1, 1)), dimension_numbers=("NCHW", "OIHW", "NCHW"),
        preferred_element_type=jnp.float32), 0.0)
    assert y_bf.shape == (N, Cout, H // 2, W // 2)
    assert jnp.allclose(y_bf, ref_bf, atol=2e-2, rtol=2e-2)

    print("KERNEL_OK")
</pallas_src>

<mosaic_0001>
module attributes {stable_mosaic.version = 11 : i64} {
  func.func @_downsample_conv_kernel(%arg0: i32, %arg1: i32, %arg2: i32, %arg3: memref<1x4x8x9x4xf32, #tpu.memory_space<vmem>>, %arg4: memref<1x4x1x9x4xf32, #tpu.memory_space<vmem>>, %arg5: memref<9x4x128xf32, #tpu.memory_space<vmem>>, %arg6: memref<1x64x128xf32, #tpu.memory_space<vmem>>, %arg7: memref<4x9x9x4xf32, #tpu.memory_space<vmem>>) attributes {dimension_semantics = [#tpu.dimension_semantics<parallel>, #tpu.dimension_semantics<parallel>, #tpu.dimension_semantics<arbitrary>], iteration_bounds = array<i64: 2, 1, 1>, scalar_prefetch = 0 : i64, scratch_operands = 1 : i64, tpu.core_type = #tpu.core_type<tc>, window_params = [{transform_indices = @transform_0, window_bounds = array<i64: 1, 4, 8, 9, 4>}, {transform_indices = @transform_1, window_bounds = array<i64: 1, 4, 1, 9, 4>}, {transform_indices = @transform_2, window_bounds = array<i64: 9, 4, 128>}, {transform_indices = @transform_3, window_bounds = array<i64: 1, 64, 128>}]} {
    %c0 = arith.constant 0 : index
    %c0_0 = arith.constant 0 : index
    %c0_1 = arith.constant 0 : index
    %c0_2 = arith.constant 0 : index
    %c0_3 = arith.constant 0 : index
    %0 = vector.load %arg3[%c0, %c0_0, %c0_1, %c0_2, %c0_3] : memref<1x4x8x9x4xf32, #tpu.memory_space<vmem>>, vector<1x4x8x9x4xf32>
    %1 = vector.shape_cast %0 : vector<1x4x8x9x4xf32> to vector<4x8x9x4xf32>
    %c0_4 = arith.constant 0 : index
    %c0_5 = arith.constant 0 : index
    %c0_6 = arith.constant 0 : index
    %c0_7 = arith.constant 0 : index
    %2 = vector.load %arg7[%c0_4, %c0_5, %c0_6, %c0_7] : memref<4x9x9x4xf32, #tpu.memory_space<vmem>>, vector<4x8x9x4xf32>
    tpu.vector_store %arg7[%c0_4, %c0_5, %c0_6, %c0_7], %1 {strides = array<i32>} : memref<4x9x9x4xf32, #tpu.memory_space<vmem>>, vector<4x8x9x4xf32>,
    %c0_8 = arith.constant 0 : index
    %c0_9 = arith.constant 0 : index
    %c0_10 = arith.constant 0 : index
    %c0_11 = arith.constant 0 : index
    %c0_12 = arith.constant 0 : index
    %3 = vector.load %arg4[%c0_8, %c0_9, %c0_10, %c0_11, %c0_12] : memref<1x4x1x9x4xf32, #tpu.memory_space<vmem>>, vector<1x4x1x9x4xf32>
    %4 = vector.shape_cast %3 : vector<1x4x1x9x4xf32> to vector<4x1x9x4xf32>
    %c0_13 = arith.constant 0 : index
    %c8 = arith.constant 8 : index
    %c0_14 = arith.constant 0 : index
    %c0_15 = arith.constant 0 : index
    %5 = vector.load %arg7[%c0_13, %c8, %c0_14, %c0_15] : memref<4x9x9x4xf32, #tpu.memory_space<vmem>>, vector<4x1x9x4xf32>
    tpu.vector_store %arg7[%c0_13, %c8, %c0_14, %c0_15], %4 {strides = array<i32>} : memref<4x9x9x4xf32, #tpu.memory_space<vmem>>, vector<4x1x9x4xf32>,
    %cst = arith.constant 0.000000e+00 : f32
    %6 = vector.broadcast %cst : f32 to vector<64x128xf32>
    %c0_16 = arith.constant 0 : index
    %c0_17 = arith.constant 0 : index
    %c0_18 = arith.constant 0 : index
    %c0_19 = arith.constant 0 : index
    %7 = vector.load %arg7[%c0_16, %c0_17, %c0_18, %c0_19] : memref<4x9x9x4xf32, #tpu.memory_space<vmem>>, vector<1x8x8x4xf32>
    %8 = vector.shape_cast %7 : vector<1x8x8x4xf32> to vector<8x8x4xf32>
    %9 = vector.shape_cast %8 : vector<8x8x4xf32> to vector<64x4xf32>
    %c0_20 = arith.constant 0 : index
    %c0_21 = arith.constant 0 : index
    %c0_22 = arith.constant 0 : index
    %10 = vector.load %arg5[%c0_20, %c0_21, %c0_22] : memref<9x4x128xf32, #tpu.memory_space<vmem>>, vector<1x4x128xf32>
    %11 = vector.shape_cast %10 : vector<1x4x128xf32> to vector<4x128xf32>
    %cst_23 = arith.constant dense<0.000000e+00> : vector<64x128xf32>
    %12 = tpu.matmul %9, %11, %cst_23 {dimension_numbers = #tpu.dot_dimension_numbers<[1], [0], [0], [1], [0, 0, 1, 1], [], []>} : vector<64x4xf32>, vector<4x128xf32>, vector<64x128xf32> -> vector<64x128xf32>
    %13 = arith.addf %6, %12 : vector<64x128xf32>
    %c1 = arith.constant 1 : index
    %c0_24 = arith.constant 0 : index
    %c0_25 = arith.constant 0 : index
    %c0_26 = arith.constant 0 : index
    %14 = vector.load %arg7[%c1, %c0_24, %c0_25, %c0_26] : memref<4x9x9x4xf32, #tpu.memory_space<vmem>>, vector<1x8x8x4xf32>
    %15 = vector.shape_cast %14 : vector<1x8x8x4xf32> to vector<8x8x4xf32>
    %16 = vector.shape_cast %15 : vector<8x8x4xf32> to vector<64x4xf32>
    %c1_27 = arith.constant 1 : index
    %c0_28 = arith.constant 0 : index
    %c0_29 = arith.constant 0 : index
    %17 = vector.load %arg5[%c1_27, %c0_28, %c0_29] : memref<9x4x128xf32, #tpu.memory_space<vmem>>, vector<1x4x128xf32>
    %18 = vector.shape_cast %17 : vector<1x4x128xf32> to vector<4x128xf32>
    %cst_30 = arith.constant dense<0.000000e+00> : vector<64x128xf32>
    %19 = tpu.matmul %16, %18, %cst_30 {dimension_numbers = #tpu.dot_dimension_numbers<[1], [0], [0], [1], [0, 0, 1, 1], [], []>} : vector<64x4xf32>, vector<4x128xf32>, vector<64x128xf32> -> vector<64x128xf32>
    %20 = arith.addf %13, %19 : vector<64x128xf32>
    %c0_31 = arith.constant 0 : index
    %c0_32 = arith.constant 0 : index
    %c1_33 = arith.constant 1 : index
    %c0_34 = arith.constant 0 : index
    %21 = vector.load %arg7[%c0_31, %c0_32, %c1_33, %c0_34] : memref<4x9x9x4xf32, #tpu.memory_space<vmem>>, vector<1x8x8x4xf32>
    %22 = vector.shape_cast %21 : vector<1x8x8x4xf32> to vector<8x8x4xf32>
    %23 = vector.shape_cast %22 : vector<8x8x4xf32> to vector<64x4xf32>
    %c2 = arith.constant 2 : index
    %c0_35 = arith.constant 0 : index
    %c0_36 = arith.constant 0 : index
    %24 = vector.load %arg5[%c2, %c0_35, %c0_36] : memref<9x4x128xf32, #tpu.memory_space<vmem>>, vector<1x4x128xf32>
    %25 = vector.shape_cast %24 : vector<1x4x128xf32> to vector<4x128xf32>
    %cst_37 = arith.constant dense<0.000000e+00> : vector<64x128xf32>
    %26 = tpu.matmul %23, %25, %cst_37 {dimension_numbers = #tpu.dot_dimension_numbers<[1], [0], [0], [1], [0, 0, 1, 1], [], []>} : vector<64x4xf32>, vector<4x128xf32>, vector<64x128xf32> -> vector<64x128xf32>
    %27 = arith.addf %20, %26 : vector<64x128xf32>
    %c2_38 = arith.constant 2 : index
    %c0_39 = arith.constant 0 : index
    %c0_40 = arith.constant 0 : index
    %c0_41 = arith.constant 0 : index
    %28 = vector.load %arg7[%c2_38, %c0_39, %c0_40, %c0_41] : memref<4x9x9x4xf32, #tpu.memory_space<vmem>>, vector<1x8x8x4xf32>
    %29 = vector.shape_cast %28 : vector<1x8x8x4xf32> to vector<8x8x4xf32>
    %30 = vector.shape_cast %29 : vector<8x8x4xf32> to vector<64x4xf32>
    %c3 = arith.constant 3 : index
    %c0_42 = arith.constant 0 : index
    %c0_43 = arith.constant 0 : index
    %31 = vector.load %arg5[%c3, %c0_42, %c0_43] : memref<9x4x128xf32, #tpu.memory_space<vmem>>, vector<1x4x128xf32>
    %32 = vector.shape_cast %31 : vector<1x4x128xf32> to vector<4x128xf32>
    %cst_44 = arith.constant dense<0.000000e+00> : vector<64x128xf32>
    %33 = tpu.matmul %30, %32, %cst_44 {dimension_numbers = #tpu.dot_dimension_numbers<[1], [0], [0], [1], [0, 0, 1, 1], [], []>} : vector<64x4xf32>, vector<4x128xf32>, vector<64x128xf32> -> vector<64x128xf32>
    %34 = arith.addf %27, %33 : vector<64x128xf32>
    %c3_45 = arith.constant 3 : index
    %c0_46 = arith.constant 0 : index
    %c0_47 = arith.constant 0 : index
    %c0_48 = arith.constant 0 : index
    %35 = vector.load %arg7[%c3_45, %c0_46, %c0_47, %c0_48] : memref<4x9x9x4xf32, #tpu.memory_space<vmem>>, vector<1x8x8x4xf32>
    %36 = vector.shape_cast %35 : vector<1x8x8x4xf32> to vector<8x8x4xf32>
    %37 = vector.shape_cast %36 : vector<8x8x4xf32> to vector<64x4xf32>
    %c4 = arith.constant 4 : index
    %c0_49 = arith.constant 0 : index
    %c0_50 = arith.constant 0 : index
    %38 = vector.load %arg5[%c4, %c0_49, %c0_50] : memref<9x4x128xf32, #tpu.memory_space<vmem>>, vector<1x4x128xf32>
    %39 = vector.shape_cast %38 : vector<1x4x128xf32> to vector<4x128xf32>
    %cst_51 = arith.constant dense<0.000000e+00> : vector<64x128xf32>
    %40 = tpu.matmul %37, %39, %cst_51 {dimension_numbers = #tpu.dot_dimension_numbers<[1], [0], [0], [1], [0, 0, 1, 1], [], []>} : vector<64x4xf32>, vector<4x128xf32>, vector<64x128xf32> -> vector<64x128xf32>
    %41 = arith.addf %34, %40 : vector<64x128xf32>
    %c2_52 = arith.constant 2 : index
    %c0_53 = arith.constant 0 : index
    %c1_54 = arith.constant 1 : index
    %c0_55 = arith.constant 0 : index
    %42 = vector.load %arg7[%c2_52, %c0_53, %c1_54, %c0_55] : memref<4x9x9x4xf32, #tpu.memory_space<vmem>>, vector<1x8x8x4xf32>
    %43 = vector.shape_cast %42 : vector<1x8x8x4xf32> to vector<8x8x4xf32>
    %44 = vector.shape_cast %43 : vector<8x8x4xf32> to vector<64x4xf32>
    %c5 = arith.constant 5 : index
    %c0_56 = arith.constant 0 : index
    %c0_57 = arith.constant 0 : index
    %45 = vector.load %arg5[%c5, %c0_56, %c0_57] : memref<9x4x128xf32, #tpu.memory_space<vmem>>, vector<1x4x128xf32>
    %46 = vector.shape_cast %45 : vector<1x4x128xf32> to vector<4x128xf32>
    %cst_58 = arith.constant dense<0.000000e+00> : vector<64x128xf32>
    %47 = tpu.matmul %44, %46, %cst_58 {dimension_numbers = #tpu.dot_dimension_numbers<[1], [0], [0], [1], [0, 0, 1, 1], [], []>} : vector<64x4xf32>, vector<4x128xf32>, vector<64x128xf32> -> vector<64x128xf32>
    %48 = arith.addf %41, %47 : vector<64x128xf32>
    %c0_59 = arith.constant 0 : index
    %c1_60 = arith.constant 1 : index
    %c0_61 = arith.constant 0 : index
    %c0_62 = arith.constant 0 : index
    %49 = vector.load %arg7[%c0_59, %c1_60, %c0_61, %c0_62] : memref<4x9x9x4xf32, #tpu.memory_space<vmem>>, vector<1x8x8x4xf32>
    %50 = vector.shape_cast %49 : vector<1x8x8x4xf32> to vector<8x8x4xf32>
    %51 = vector.shape_cast %50 : vector<8x8x4xf32> to vector<64x4xf32>
    %c6 = arith.constant 6 : index
    %c0_63 = arith.constant 0 : index
    %c0_64 = arith.constant 0 : index
    %52 = vector.load %arg5[%c6, %c0_63, %c0_64] : memref<9x4x128xf32, #tpu.memory_space<vmem>>, vector<1x4x128xf32>
    %53 = vector.shape_cast %52 : vector<1x4x128xf32> to vector<4x128xf32>
    %cst_65 = arith.constant dense<0.000000e+00> : vector<64x128xf32>
    %54 = tpu.matmul %51, %53, %cst_65 {dimension_numbers = #tpu.dot_dimension_numbers<[1], [0], [0], [1], [0, 0, 1, 1], [], []>} : vector<64x4xf32>, vector<4x128xf32>, vector<64x128xf32> -> vector<64x128xf32>
    %55 = arith.addf %48, %54 : vector<64x128xf32>
    %c1_66 = arith.constant 1 : index
    %c1_67 = arith.constant 1 : index
    %c0_68 = arith.constant 0 : index
    %c0_69 = arith.constant 0 : index
    %56 = vector.load %arg7[%c1_66, %c1_67, %c0_68, %c0_69] : memref<4x9x9x4xf32, #tpu.memory_space<vmem>>, vector<1x8x8x4xf32>
    %57 = vector.shape_cast %56 : vector<1x8x8x4xf32> to vector<8x8x4xf32>
    %58 = vector.shape_cast %57 : vector<8x8x4xf32> to vector<64x4xf32>
    %c7 = arith.constant 7 : index
    %c0_70 = arith.constant 0 : index
    %c0_71 = arith.constant 0 : index
    %59 = vector.load %arg5[%c7, %c0_70, %c0_71] : memref<9x4x128xf32, #tpu.memory_space<vmem>>, vector<1x4x128xf32>
    %60 = vector.shape_cast %59 : vector<1x4x128xf32> to vector<4x128xf32>
    %cst_72 = arith.constant dense<0.000000e+00> : vector<64x128xf32>
    %61 = tpu.matmul %58, %60, %cst_72 {dimension_numbers = #tpu.dot_dimension_numbers<[1], [0], [0], [1], [0, 0, 1, 1], [], []>} : vector<64x4xf32>, vector<4x128xf32>, vector<64x128xf32> -> vector<64x128xf32>
    %62 = arith.addf %55, %61 : vector<64x128xf32>
    %c0_73 = arith.constant 0 : index
    %c1_74 = arith.constant 1 : index
    %c1_75 = arith.constant 1 : index
    %c0_76 = arith.constant 0 : index
    %63 = vector.load %arg7[%c0_73, %c1_74, %c1_75, %c0_76] : memref<4x9x9x4xf32, #tpu.memory_space<vmem>>, vector<1x8x8x4xf32>
    %64 = vector.shape_cast %63 : vector<1x8x8x4xf32> to vector<8x8x4xf32>
    %65 = vector.shape_cast %64 : vector<8x8x4xf32> to vector<64x4xf32>
    %c8_77 = arith.constant 8 : index
    %c0_78 = arith.constant 0 : index
    %c0_79 = arith.constant 0 : index
    %66 = vector.load %arg5[%c8_77, %c0_78, %c0_79] : memref<9x4x128xf32, #tpu.memory_space<vmem>>, vector<1x4x128xf32>
    %67 = vector.shape_cast %66 : vector<1x4x128xf32> to vector<4x128xf32>
    %cst_80 = arith.constant dense<0.000000e+00> : vector<64x128xf32>
    %68 = tpu.matmul %65, %67, %cst_80 {dimension_numbers = #tpu.dot_dimension_numbers<[1], [0], [0], [1], [0, 0, 1, 1], [], []>} : vector<64x4xf32>, vector<4x128xf32>, vector<64x128xf32> -> vector<64x128xf32>
    %69 = arith.addf %62, %68 : vector<64x128xf32>
    %cst_81 = arith.constant 0.000000e+00 : f32
    %70 = vector.broadcast %cst_81 : f32 to vector<64x128xf32>
    %71 = arith.maximumf %69, %70 : vector<64x128xf32>
    %c0_82 = arith.constant 0 : index
    %c0_83 = arith.constant 0 : index
    %c0_84 = arith.constant 0 : index
    %72 = vector.load %arg6[%c0_82, %c0_83, %c0_84] : memref<1x64x128xf32, #tpu.memory_space<vmem>>, vector<1x64x128xf32>
    %73 = vector.shape_cast %72 : vector<1x64x128xf32> to vector<64x128xf32>
    %74 = vector.shape_cast %71 : vector<64x128xf32> to vector<1x64x128xf32>
    tpu.vector_store %arg6[%c0_82, %c0_83, %c0_84], %74 {strides = array<i32>} : memref<1x64x128xf32, #tpu.memory_space<vmem>>, vector<1x64x128xf32>,
    return
  }
  func.func @transform_0(%arg0: i32, %arg1: i32, %arg2: i32) -> (i32, i32, i32, i32, i32) {
    %c0_i32 = arith.constant 0 : i32
    %c0_i32_0 = arith.constant 0 : i32
    %c0_i32_1 = arith.constant 0 : i32
    %c0_i32_2 = arith.constant 0 : i32
    return %arg0, %c0_i32, %arg1, %c0_i32_0, %c0_i32_1 : i32, i32, i32, i32, i32
  }
  func.func @transform_1(%arg0: i32, %arg1: i32, %arg2: i32) -> (i32, i32, i32, i32, i32) {
    %c1_i32 = arith.constant 1 : i32
    %0 = arith.addi %arg1, %c1_i32 : i32
    %c8_i32 = arith.constant 8 : i32
    %1 = arith.muli %0, %c8_i32 : i32
    %c0_i32 = arith.constant 0 : i32
    %c0_i32_0 = arith.constant 0 : i32
    %c0_i32_1 = arith.constant 0 : i32
    %c0_i32_2 = arith.constant 0 : i32
    return %arg0, %c0_i32, %1, %c0_i32_0, %c0_i32_1 : i32, i32, i32, i32, i32
  }
  func.func @transform_2(%arg0: i32, %arg1: i32, %arg2: i32) -> (i32, i32, i32) {
    %c0_i32 = arith.constant 0 : i32
    %c0_i32_0 = arith.constant 0 : i32
    %c0_i32_1 = arith.constant 0 : i32
    return %c0_i32, %c0_i32_0, %arg2 : i32, i32, i32
  }
  func.func @transform_3(%arg0: i32, %arg1: i32, %arg2: i32) -> (i32, i32, i32) {
    %c0_i32 = arith.constant 0 : i32
    return %arg0, %arg1, %arg2 : i32, i32, i32
  }
}

</mosaic_0001>

<bundles_post_ra>
// kernel: downsample_conv.1
= control target key start
LH: loop header
LB: loop body
LE: loop exit
PB: predicated region body
PF: predicated region fallthrough
CT: control target
= control target key end

     0   :  { %s2945_s12 = smov 0   ;;  %s2947_s13 = smov 0   ;;  %s3449_s0 = inlined_call_operand.vmem [shape: f32[2,4,9,9,4], index: 0, kind: input, shape index: {}, may-alias: {0,1}]   ;;  %s3450_s1 = inlined_call_operand.vmem [shape: f32[2,4,9,9,4], index: 1, kind: input, shape index: {}, may-alias: {0,1}]   ;;  %s3451_s2 = inlined_call_operand.vmem [shape: f32[9,4,128], index: 2, kind: input, shape index: {}]   ;;  %s3452_s3 = inlined_call_operand.vmem [shape: f32[2,64,128], index: 3, kind: output, shape index: {}]  }
   0x1   :  { %s2949_s14 = smov 0   ;;  %s2951_s15 = smov 0  }
   0x2   :  { %s2953_s16 = smov 0  }
   0x3 LB: > { %s32_s17 = sadd.s32 1, %s2915_s15  ;;  %p48_p1 = scmp.ne.s32.totalorder %s2907_s13, %s2903_s12  ;;  %s2919_s16 = sphi %s2953_s16, %s13_s16   ;;  %s2915_s15 = sphi %s2951_s15, %s3457_s15   ;;  %s2911_s14 = sphi %s2949_s14, %s3456_s14   ;;  %s2907_s13 = sphi %s2947_s13, %s3455_s13   ;;  %s2903_s12 = sphi %s2945_s12, %s3454_s12  }
   0x4   : > { %p34_p0 = scmp.ge.s32.totalorder %s32_s17, 2  ;;  %p49_p2 = scmp.eq.s32.totalorder %s2919_s16, 0 }
   0x5   : > { %s41_s20 = sadd.s32 1, %s2907_s13  ;;  %p2401_p5 = scmp.ge.s32.totalorder %s2919_s16, 2 }
   0x6   : > { %s3459_s17 = smov (%p34_p0, %s32_s17), 0  ;;  %p2976_p3 = por %p49_p2, %p48_p1 }
   0x7   : > { %s36_s19 = ssub.s32 %s2915_s15, %s3459_s17  ;;  %169 = sbr.rel (%p2401_p5) target bundleno = 63 (0x3f), region = 20 }
   0x8   : > { %p39_p4 = scmp.eq.s32.totalorder %s36_s19, 0 }
   0xa   : > { %s2984_s21 = scalar_select %p39_p4, %s2907_s13, %s41_s20  }
   0xe   : > { %172 = sbr.rel (!%p2976_p3) target bundleno = 54 (0x36), region = 24  ;;  %s174_s22 = sand.u32 (%p2976_p3), 1, %s2907_s13  }
   0xf   : > { %s2792_s23 = smul.u32 (%p2976_p3), 576, %s2915_s15  ;;  %s2402_s24 = sshll.u32 (%p2976_p3), %s174_s22, 9 }
  0x10   : > { %s2996_s28 = scalar_lea.vmem (%p2976_p3), [#allocation3], %s2402_s24   ;;  %s2998_s29 = smov (%p2976_p3), 0  }
  0x11   : > { %s2994_s27 = scalar_lea.vmem (%p2976_p3), %s3449_s0, %s2792_s23  }
  0x15 LB: >> { %v386_v0 = vld [vmem:[%s2994_s27] sm:$0xff]  ;;  %v388_v1 = vld [vmem:[%s2994_s27 + $0x8] sm:$0xff]  ;;  %v390_v2 = vld [vmem:[%s2994_s27 + $0x10] sm:$0xff]  ;;  %s380_s29 = sadd.s32 1, %s2923_s29   ;;  %s2923_s29 = sphi %s2998_s29, %s380_s29  }
  0x16   : >> { %387 = vst [vmem:[%s2996_s28] sm:$0xff] %v386_v0  ;;  %389 = vst [vmem:[%s2996_s28 + $0x8] sm:$0xff] %v388_v1  ;;  %v392_v3 = vld [vmem:[%s2994_s27 + $0x18] sm:$0xff]  ;;  %v394_v4 = vld [vmem:[%s2994_s27 + $0x20] sm:$0xff]  ;;  %p379_p6 = scmp.ge.s32.totalorder %s380_s29, 1 }
  0x17   : >> { %391 = vst [vmem:[%s2996_s28 + $0x10] sm:$0xff] %v390_v2  ;;  %v396_v5 = vld [vmem:[%s2994_s27 + $0x28] sm:$0xff]  ;;  %393 = vst [vmem:[%s2996_s28 + $0x18] sm:$0xff] %v392_v3  ;;  %v398_v6 = vld [vmem:[%s2994_s27 + $0x30] sm:$0xff] }
  0x18   : >> { %395 = vst [vmem:[%s2996_s28 + $0x20] sm:$0xff] %v394_v4  ;;  %397 = vst [vmem:[%s2996_s28 + $0x28] sm:$0xff] %v396_v5  ;;  %v400_v7 = vld [vmem:[%s2994_s27 + $0x38] sm:$0xff]  ;;  %v402_v8 = vld [vmem:[%s2994_s27 + $0x40] sm:$0xff] }
  0x19   : >> { %399 = vst [vmem:[%s2996_s28 + $0x30] sm:$0xff] %v398_v6  ;;  %401 = vst [vmem:[%s2996_s28 + $0x38] sm:$0xff] %v400_v7  ;;  %v404_v9 = vld [vmem:[%s2994_s27 + $0x48] sm:$0xff]  ;;  %v406_v10 = vld [vmem:[%s2994_s27 + $0x50] sm:$0xff] }
  0x1a   : >> { %403 = vst [vmem:[%s2996_s28 + $0x40] sm:$0xff] %v402_v8  ;;  %v408_v11 = vld [vmem:[%s2994_s27 + $0x58] sm:$0xff]  ;;  %405 = vst [vmem:[%s2996_s28 + $0x48] sm:$0xff] %v404_v9  ;;  %v410_v12 = vld [vmem:[%s2994_s27 + $0x60] sm:$0xff] }
  0x1b   : >> { %407 = vst [vmem:[%s2996_s28 + $0x50] sm:$0xff] %v406_v10  ;;  %409 = vst [vmem:[%s2996_s28 + $0x58] sm:$0xff] %v408_v11  ;;  %v412_v13 = vld [vmem:[%s2994_s27 + $0x68] sm:$0xff]  ;;  %v414_v14 = vld [vmem:[%s2994_s27 + $0x70] sm:$0xff] }
  0x1c   : >> { %411 = vst [vmem:[%s2996_s28 + $0x60] sm:$0xff] %v410_v12  ;;  %413 = vst [vmem:[%s2996_s28 + $0x68] sm:$0xff] %v412_v13  ;;  %v416_v15 = vld [vmem:[%s2994_s27 + $0x78] sm:$0xff]  ;;  %v418_v16 = vld [vmem:[%s2994_s27 + $0x90] sm:$0xff] }
  0x1d   : >> { %415 = vst [vmem:[%s2996_s28 + $0x70] sm:$0xff] %v414_v14  ;;  %v420_v17 = vld [vmem:[%s2994_s27 + $0x98] sm:$0xff]  ;;  %417 = vst [vmem:[%s2996_s28 + $0x78] sm:$0xff] %v416_v15  ;;  %v422_v18 = vld [vmem:[%s2994_s27 + $0xa0] sm:$0xff] }
  0x1e   : >> { %419 = vst [vmem:[%s2996_s28 + $0x80] sm:$0xff] %v418_v16  ;;  %421 = vst [vmem:[%s2996_s28 + $0x88] sm:$0xff] %v420_v17  ;;  %v424_v19 = vld [vmem:[%s2994_s27 + $0xa8] sm:$0xff]  ;;  %v426_v20 = vld [vmem:[%s2994_s27 + $0xb0] sm:$0xff] }
  0x1f   : >> { %423 = vst [vmem:[%s2996_s28 + $0x90] sm:$0xff] %v422_v18  ;;  %425 = vst [vmem:[%s2996_s28 + $0x98] sm:$0xff] %v424_v19  ;;  %v428_v21 = vld [vmem:[%s2994_s27 + $0xb8] sm:$0xff]  ;;  %v430_v22 = vld [vmem:[%s2994_s27 + $0xc0] sm:$0xff] }
  0x20   : >> { %427 = vst [vmem:[%s2996_s28 + $0xa0] sm:$0xff] %v426_v20  ;;  %v432_v23 = vld [vmem:[%s2994_s27 + $0xc8] sm:$0xff]  ;;  %429 = vst [vmem:[%s2996_s28 + $0xa8] sm:$0xff] %v428_v21  ;;  %v434_v24 = vld [vmem:[%s2994_s27 + $0xd0] sm:$0xff] }
  0x21   : >> { %431 = vst [vmem:[%s2996_s28 + $0xb0] sm:$0xff] %v430_v22  ;;  %433 = vst [vmem:[%s2996_s28 + $0xb8] sm:$0xff] %v432_v23  ;;  %v436_v25 = vld [vmem:[%s2994_s27 + $0xd8] sm:$0xff]  ;;  %v438_v26 = vld [vmem:[%s2994_s27 + $0xe0] sm:$0xff] }
  0x22   : >> { %435 = vst [vmem:[%s2996_s28 + $0xc0] sm:$0xff] %v434_v24  ;;  %437 = vst [vmem:[%s2996_s28 + $0xc8] sm:$0xff] %v436_v25  ;;  %v440_v27 = vld [vmem:[%s2994_s27 + $0xe8] sm:$0xff]  ;;  %v442_v28 = vld [vmem:[%s2994_s27 + $0xf0] sm:$0xff] }
  0x23   : >> { %439 = vst [vmem:[%s2996_s28 + $0xd0] sm:$0xff] %v438_v26  ;;  %v444_v29 = vld [vmem:[%s2994_s27 + $0xf8] sm:$0xff]  ;;  %441 = vst [vmem:[%s2996_s28 + $0xd8] sm:$0xff] %v440_v27  ;;  %v446_v30 = vld [vmem:[%s2994_s27 + $0x100] sm:$0xff] }
  0x24   : >> { %443 = vst [vmem:[%s2996_s28 + $0xe0] sm:$0xff] %v442_v28  ;;  %445 = vst [vmem:[%s2996_s28 + $0xe8] sm:$0xff] %v444_v29  ;;  %v448_v31 = vld [vmem:[%s2994_s27 + $0x108] sm:$0xff]  ;;  %v450_v32 = vld [vmem:[%s2994_s27 + $0x120] sm:$0xff] }
  0x25   : >> { %447 = vst [vmem:[%s2996_s28 + $0xf0] sm:$0xff] %v446_v30  ;;  %449 = vst [vmem:[%s2996_s28 + $0xf8] sm:$0xff] %v448_v31  ;;  %v452_v33 = vld [vmem:[%s2994_s27 + $0x128] sm:$0xff]  ;;  %v454_v34 = vld [vmem:[%s2994_s27 + $0x130] sm:$0xff] }
  0x26   : >> { %451 = vst [vmem:[%s2996_s28 + $0x100] sm:$0xff] %v450_v32  ;;  %v456_v35 = vld [vmem:[%s2994_s27 + $0x138] sm:$0xff]  ;;  %453 = vst [vmem:[%s2996_s28 + $0x108] sm:$0xff] %v452_v33  ;;  %v458_v36 = vld [vmem:[%s2994_s27 + $0x140] sm:$0xff] }
  0x27   : >> { %455 = vst [vmem:[%s2996_s28 + $0x110] sm:$0xff] %v454_v34  ;;  %457 = vst [vmem:[%s2996_s28 + $0x118] sm:$0xff] %v456_v35  ;;  %v460_v37 = vld [vmem:[%s2994_s27 + $0x148] sm:$0xff]  ;;  %v462_v38 = vld [vmem:[%s2994_s27 + $0x150] sm:$0xff] }
  0x28   : >> { %459 = vst [vmem:[%s2996_s28 + $0x120] sm:$0xff] %v458_v36  ;;  %461 = vst [vmem:[%s2996_s28 + $0x128] sm:$0xff] %v460_v37  ;;  %v464_v39 = vld [vmem:[%s2994_s27 + $0x158] sm:$0xff]  ;;  %v466_v40 = vld [vmem:[%s2994_s27 + $0x160] sm:$0xff] }
  0x29   : >> { %463 = vst [vmem:[%s2996_s28 + $0x130] sm:$0xff] %v462_v38  ;;  %v468_v41 = vld [vmem:[%s2994_s27 + $0x168] sm:$0xff]  ;;  %465 = vst [vmem:[%s2996_s28 + $0x138] sm:$0xff] %v464_v39  ;;  %v470_v42 = vld [vmem:[%s2994_s27 + $0x170] sm:$0xff] }
  0x2a   : >> { %467 = vst [vmem:[%s2996_s28 + $0x140] sm:$0xff] %v466_v40  ;;  %469 = vst [vmem:[%s2996_s28 + $0x148] sm:$0xff] %v468_v41  ;;  %v472_v43 = vld [vmem:[%s2994_s27 + $0x178] sm:$0xff]  ;;  %v474_v44 = vld [vmem:[%s2994_s27 + $0x180] sm:$0xff] }
  0x2b   : >> { %471 = vst [vmem:[%s2996_s28 + $0x150] sm:$0xff] %v470_v42  ;;  %473 = vst [vmem:[%s2996_s28 + $0x158] sm:$0xff] %v472_v43  ;;  %v476_v45 = vld [vmem:[%s2994_s27 + $0x188] sm:$0xff]  ;;  %v478_v46 = vld [vmem:[%s2994_s27 + $0x190] sm:$0xff] }
  0x2c   : >> { %475 = vst [vmem:[%s2996_s28 + $0x160] sm:$0xff] %v474_v44  ;;  %v480_v47 = vld [vmem:[%s2994_s27 + $0x198] sm:$0xff]  ;;  %477 = vst [vmem:[%s2996_s28 + $0x168] sm:$0xff] %v476_v45  ;;  %v482_v48 = vld [vmem:[%s2994_s27 + $0x1b0] sm:$0xff] }
  0x2d   : >> { %479 = vst [vmem:[%s2996_s28 + $0x170] sm:$0xff] %v478_v46  ;;  %481 = vst [vmem:[%s2996_s28 + $0x178] sm:$0xff] %v480_v47  ;;  %v484_v49 = vld [vmem:[%s2994_s27 + $0x1b8] sm:$0xff]  ;;  %v486_v50 = vld [vmem:[%s2994_s27 + $0x1c0] sm:$0xff] }
  0x2e   : >> { %483 = vst [vmem:[%s2996_s28 + $0x180] sm:$0xff] %v482_v48  ;;  %485 = vst [vmem:[%s2996_s28 + $0x188] sm:$0xff] %v484_v49  ;;  %v488_v51 = vld [vmem:[%s2994_s27 + $0x1c8] sm:$0xff]  ;;  %v490_v52 = vld [vmem:[%s2994_s27 + $0x1d0] sm:$0xff] }
  0x2f   : >> { %487 = vst [vmem:[%s2996_s28 + $0x190] sm:$0xff] %v486_v50  ;;  %v492_v53 = vld [vmem:[%s2994_s27 + $0x1d8] sm:$0xff]  ;;  %489 = vst [vmem:[%s2996_s28 + $0x198] sm:$0xff] %v488_v51  ;;  %v494_v54 = vld [vmem:[%s2994_s27 + $0x1e0] sm:$0xff]  ;;  %382 = sbr.rel (!%p379_p6) target bundleno = 21 (0x15), region = 190 }
  0x30   : >> { %491 = vst [vmem:[%s2996_s28 + $0x1a0] sm:$0xff] %v490_v52  ;;  %493 = vst [vmem:[%s2996_s28 + $0x1a8] sm:$0xff] %v492_v53  ;;  %v496_v55 = vld [vmem:[%s2994_s27 + $0x1e8] sm:$0xff]  ;;  %v498_v56 = vld [vmem:[%s2994_s27 + $0x1f0] sm:$0xff] }
  0x31   : >> { %495 = vst [vmem:[%s2996_s28 + $0x1b0] sm:$0xff] %v494_v54  ;;  %497 = vst [vmem:[%s2996_s28 + $0x1b8] sm:$0xff] %v496_v55  ;;  %v500_v57 = vld [vmem:[%s2994_s27 + $0x1f8] sm:$0xff]  ;;  %v502_v58 = vld [vmem:[%s2994_s27 + $0x200] sm:$0xff] }
  0x32   : >> { %499 = vst [vmem:[%s2996_s28 + $0x1c0] sm:$0xff] %v498_v56  ;;  %v504_v59 = vld [vmem:[%s2994_s27 + $0x208] sm:$0xff]  ;;  %501 = vst [vmem:[%s2996_s28 + $0x1c8] sm:$0xff] %v500_v57  ;;  %v506_v60 = vld [vmem:[%s2994_s27 + $0x210] sm:$0xff] }
  0x33   : >> { %503 = vst [vmem:[%s2996_s28 + $0x1d0] sm:$0xff] %v502_v58  ;;  %505 = vst [vmem:[%s2996_s28 + $0x1d8] sm:$0xff] %v504_v59  ;;  %v508_v61 = vld [vmem:[%s2994_s27 + $0x218] sm:$0xff]  ;;  %v510_v62 = vld [vmem:[%s2994_s27 + $0x220] sm:$0xff] }
  0x34   : >> { %507 = vst [vmem:[%s2996_s28 + $0x1e0] sm:$0xff] %v506_v60  ;;  %509 = vst [vmem:[%s2996_s28 + $0x1e8] sm:$0xff] %v508_v61  ;;  %v512_v63 = vld [vmem:[%s2994_s27 + $0x228] sm:$0xff] }
  0x35   : >> { %511 = vst [vmem:[%s2996_s28 + $0x1f0] sm:$0xff] %v510_v62  ;;  %513 = vst [vmem:[%s2996_s28 + $0x1f8] sm:$0xff] %v512_v63 }
  0x36 PF: > { %557 = sbr.rel (!%p2976_p3) target bundleno = 63 (0x3f), region = 76  ;;  %s559_s30 = sand.u32 (%p2976_p3), 1, %s2907_s13  }
  0x37   : > { %s2413_s4 = smul.u32 (%p2976_p3), 576, %s2915_s15  ;;  %s2412_s5 = sshll.u32 (%p2976_p3), %s559_s30, 6 }
  0x38   : > { %s561_s9 = scalar_lea.vmem (%p2976_p3), [#allocation4], %s2412_s5 }
  0x39   : > { %s2284_s8 = scalar_lea.vmem (%p2976_p3), %s3450_s1, %s2413_s4 }
  0x3a   : > { %v2414_v0 = vld [vmem:[%s2284_s8 + $0x80] sm:$0xff] (%p2976_p3)  ;;  %v2415_v1 = vld [vmem:[%s2284_s8 + $0x88] sm:$0xff] (%p2976_p3)  ;;  %v2416_v2 = vld [vmem:[%s2284_s8 + $0x110] sm:$0xff] (%p2976_p3) }
  0x3b   : > { %611 = vst [vmem:[%s561_s9] sm:$0xff] (%p2976_p3), %v2414_v0  ;;  %613 = vst [vmem:[%s561_s9 + $0x8] sm:$0xff] (%p2976_p3), %v2415_v1  ;;  %v2417_v3 = vld [vmem:[%s2284_s8 + $0x118] sm:$0xff] (%p2976_p3)  ;;  %v2418_v4 = vld [vmem:[%s2284_s8 + $0x1a0] sm:$0xff] (%p2976_p3) }
  0x3c   : > { %615 = vst [vmem:[%s561_s9 + $0x10] sm:$0xff] (%p2976_p3), %v2416_v2  ;;  %v2419_v5 = vld [vmem:[%s2284_s8 + $0x1a8] sm:$0xff] (%p2976_p3)  ;;  %617 = vst [vmem:[%s561_s9 + $0x18] sm:$0xff] (%p2976_p3), %v2417_v3  ;;  %v2420_v6 = vld [vmem:[%s2284_s8 + $0x230] sm:$0xff] (%p2976_p3) }
  0x3d   : > { %619 = vst [vmem:[%s561_s9 + $0x20] sm:$0xff] %v2418_v4  ;;  %621 = vst [vmem:[%s561_s9 + $0x28] sm:$0xff] %v2419_v5  ;;  %v2421_v7 = vld [vmem:[%s2284_s8 + $0x238] sm:$0xff] }
  0x3e   : > { %623 = vst [vmem:[%s561_s9 + $0x30] sm:$0xff] %v2420_v6  ;;  %625 = vst [vmem:[%s561_s9 + $0x38] sm:$0xff] %v2421_v7 }
  0x3f PF: > { %p2422_p7 = scmp.ge.s32.totalorder %s2919_s16, 1  ;;  %p630_p8 = scmp.lt.s32.totalorder %s2919_s16, 3 }
  0x41   : > { %p631_p9 = pnand %p2422_p7, %p630_p8 }
  0x42   : > { %v2427_v8 = vld [vmem:[%s3451_s2 + $0x4] sm:$0xf] (!%p631_p9)  ;;  %vm898_vm0 = vcmask (!%p631_p9), 1043456   ;;  %v3149_v9 = vld [vmem:[%s3451_s2 + $0x10] sm:$0xf] (!%p631_p9)  ;;  %s637_s20 = sand.u32 (!%p631_p9), 1, %s2903_s12  }
  0x43   : > { %634 = sbr.rel (%p631_p9) target bundleno = 367 (0x16f), region = 114  ;;  %2600 = vmatprep.subr.msk.mxu1 (!%p631_p9), %vm898_vm0, %v2427_v8  ;;  %2656 = vmatprep.subr.msk.mxu0 (!%p631_p9), %vm898_vm0, %v3149_v9  ;;  %s2423_s22 = sshll.u32 (!%p631_p9), %s637_s20, 9  ;;  %vm771_vm1 = vcmask (!%p631_p9), 31744   ;;  %v862_v10 = vld [vmem:[%s3451_s2] sm:$0xf] (!%p631_p9)  ;;  %vm773_vm2 = vcmask (!%p631_p9), 24576  }
  0x44   : > { %v2476_v11 = vld [vmem:[%s3451_s2 + $0x14] sm:$0xf] (!%p631_p9)  ;;  %2601 = vmatpush3.msk.msra.mxu1 (!%p631_p9), %vm898_vm0, %v2427_v8  ;;  %2657 = vmatpush3.msk.msra.mxu0 (!%p631_p9), %vm898_vm0, %v3149_v9  ;;  %s3166_s27 = scalar_lea.vmem (!%p631_p9), [#allocation3], %s2423_s22  ;;  %v3197_v26 = vld [vmem:[%s3451_s2 + $0x18] sm:$0xf] (!%p631_p9)  ;;  %s2424_s7 = sshll.u32 (!%p631_p9), %s637_s20, 6 }
  0x45   : > { %v723_v12 = vld [vmem:[%s3166_s27 + $0x80] sm:$0xff] (!%p631_p9)  ;;  %2614 = vmatprep.subr.msk.mxu1 (!%p631_p9), %vm898_vm0, %v862_v10  ;;  %2670 = vmatprep.subr.msk.mxu0 (!%p631_p9), %vm898_vm0, %v2476_v11  ;;  %v725_v14 = vld [vmem:[%s3166_s27 + $0x90] sm:$0xff] (!%p631_p9)  ;;  %v740_v22 = vld [vmem:[%s3166_s27 + $0x108] sm:$0x1] (!%p631_p9)  ;;  %s3319_s9 = scalar_lea.vmem (!%p631_p9), [#allocation4], %s2424_s7  ;;  %p695_p10 = scmp.lt.s32.totalorder (!%p631_p9), %s2911_s14, 1 }
  0x46   : > { %v755_v13 = vld [vmem:[%s3166_s27 + $0x180] sm:$0xff] (!%p631_p9)  ;;  %789 = vst.msk [vmem:[#allocation2 + $0x90] sm:$0xff] (!%p631_p9), %vm771_vm1, %v723_v12  ;;  %791 = vst.msk [vmem:[#allocation2 + $0xa0] sm:$0xff] (!%p631_p9), %vm771_vm1, %v725_v14  ;;  %v757_v15 = vld [vmem:[%s3166_s27 + $0x190] sm:$0xff] (!%p631_p9) }
  0x47   : > { %821 = vst.msk [vmem:[#allocation2 + $0x1b0] sm:$0xff] (!%p631_p9), %vm771_vm1, %v755_v13  ;;  %v727_v16 = vld [vmem:[%s3166_s27 + $0xa0] sm:$0xff] (!%p631_p9)  ;;  %823 = vst.msk [vmem:[#allocation2 + $0x1c0] sm:$0xff] (!%p631_p9), %vm771_vm1, %v757_v15  ;;  %v729_v18 = vld [vmem:[%s3166_s27 + $0xb0] sm:$0xff] (!%p631_p9) }
  0x48   : > { %v759_v17 = vld [vmem:[%s3166_s27 + $0x1a0] sm:$0xff] (!%p631_p9)  ;;  %793 = vst.msk [vmem:[#allocation2 + $0xb0] sm:$0xff] (!%p631_p9), %vm771_vm1, %v727_v16  ;;  %v761_v19 = vld [vmem:[%s3166_s27 + $0x1b0] sm:$0xff] (!%p631_p9)  ;;  %795 = vst.msk [vmem:[#allocation2 + $0xc0] sm:$0xff] (!%p631_p9), %vm771_vm1, %v729_v18 }
  0x49   : > { %825 = vst.msk [vmem:[#allocation2 + $0x1d0] sm:$0xff] (!%p631_p9), %vm771_vm1, %v759_v17  ;;  %v731_v20 = vld [vmem:[%s3166_s27 + $0xc0] sm:$0xff] (!%p631_p9)  ;;  %827 = vst.msk [vmem:[#allocation2 + $0x1e0] sm:$0xff] (!%p631_p9), %vm771_vm1, %v761_v19  ;;  %v3202_v27 = vld [vmem:[%s3451_s2 + $0x8] sm:$0xf] (!%p631_p9) }
  0x4a   : > { %797 = vst.msk [vmem:[#allocation2 + $0xd0] sm:$0xff] %vm771_vm1, %v731_v20  ;;  %v739_v21 = vld [vmem:[%s3166_s27 + $0x100] sm:$0xff]  ;;  %v733_v34 = vld [vmem:[%s3166_s27 + $0xd0] sm:$0xff]  ;;  %v742_v36 = vld [vmem:[%s3166_s27 + $0x118] sm:$0x1]  ;;  %s3461_s14 = smov (!%p695_p10, %s2911_s14), 1 }
  0x4b   : > { %805 = vst.msk [vmem:[#allocation2 + $0x120] sm:$0xff] %vm771_vm1, %v739_v21  ;;  %v741_v35 = vld [vmem:[%s3166_s27 + $0x110] sm:$0xff]  ;;  %799 = vst.msk [vmem:[#allocation2 + $0xe0] sm:$0xff] %vm771_vm1, %v733_v34  ;;  %v735_v37 = vld [vmem:[%s3166_s27 + $0xe0] sm:$0xff]  ;;  %s2518_s18 = sshll.u32 %s3461_s14, 6 }
  0x4c   : > { %806 = vst.msk [vmem:[#allocation2 + $0x128] sm:$0x1] %vm773_vm2, %v740_v22  ;;  %808 = vst.msk [vmem:[#allocation2 + $0x138] sm:$0x1] %vm773_vm2, %v742_v36  ;;  %v743_v38 = vld [vmem:[%s3166_s27 + $0x120] sm:$0xff]  ;;  %v737_v41 = vld [vmem:[%s3166_s27 + $0xf0] sm:$0xff]  ;;  %s3424_s22 = scalar_lea.vmem %s3452_s3, %s2518_s18 }
  0x4d   : > { %v864_v23 = vld [vmem:[#allocation2 + $0x90] sm:$0xff]  ;;  %v3192_v25 = vld [vmem:[#allocation2 + $0xa0] sm:$0xff]  ;;  %807 = vst.msk [vmem:[#allocation2 + $0x130] sm:$0xff] %vm771_vm1, %v741_v35  ;;  %v744_v39 = vld [vmem:[%s3166_s27 + $0x128] sm:$0x1] }
  0x4e   : > { %v1441_v24 = vld [vmem:[#allocation2 + $0x1b0] sm:$0xff]  ;;  %2602 = vmatprep.mubr.msk.f32.mxu1 %vm771_vm1, %v864_v23  ;;  %v1442_v28 = vld [vmem:[#allocation2 + $0x1c0] sm:$0xff]  ;;  %801 = vst.msk [vmem:[#allocation2 + $0xf0] sm:$0xff] %vm771_vm1, %v735_v37  ;;  %809 = vst.msk [vmem:[#allocation2 + $0x140] sm:$0xff] %vm771_vm1, %v743_v38 }
  0x4f   : > { %2658 = vmatprep.mubr.msk.f32.mxu0 %vm771_vm1, %v1441_v24  ;;  %v3206_v29 = vld [vmem:[#allocation2 + $0xb0] sm:$0xff]  ;;  %2603 = vmatmul.mubr.msk.f32.vlgmr.msra.gmra.mrb[0].mxu1 %vm771_vm1, %v3192_v25  ;;  %v3211_v31 = vld [vmem:[#allocation2 + $0xc0] sm:$0xff]  ;;  %810 = vst.msk [vmem:[#allocation2 + $0x148] sm:$0x1] %vm773_vm2, %v744_v39  ;;  %v746_v43 = vld [vmem:[%s3166_s27 + $0x138] sm:$0x1] }
  0x50   : > { %v1443_v30 = vld [vmem:[#allocation2 + $0x1d0] sm:$0xff]  ;;  %2659 = vmatmul.mubr.msk.f32.vlgmr.msra.gmra.mrb[0].mxu0 %vm771_vm1, %v1442_v28  ;;  %v1444_v32 = vld [vmem:[#allocation2 + $0x1e0] sm:$0xff]  ;;  %2615 = vmatpush3.msk.msra.mxu1 %vm898_vm0, %v862_v10  ;;  %803 = vst.msk [vmem:[#allocation2 + $0x100] sm:$0xff] %vm771_vm1, %v737_v41  ;;  %v748_v46 = vld [vmem:[%s3166_s27 + $0x148] sm:$0x1] }
  0x51   : > { %v3213_v33 = vld [vmem:[#allocation2 + $0xd0] sm:$0xff]  ;;  %2671 = vmatpush3.msk.msra.mxu0 %vm898_vm0, %v2476_v11  ;;  %2605 = vmatprep.mubr.msk.f32.mxu1 %vm771_vm1, %v3206_v29  ;;  %v707_v44 = vld [vmem:[%s3166_s27] sm:$0xff]  ;;  %812 = vst.msk [vmem:[#allocation2 + $0x158] sm:$0x1] %vm773_vm2, %v746_v43  ;;  %814 = vst.msk [vmem:[#allocation2 + $0x168] sm:$0x1] %vm773_vm2, %v748_v46 }
  0x52   : > { %2661 = vmatprep.mubr.msk.f32.mxu0 %vm771_vm1, %v1443_v30  ;;  %2684 = vmatprep.subr.msk.mxu0 %vm898_vm0, %v3197_v26  ;;  %v745_v42 = vld [vmem:[%s3166_s27 + $0x130] sm:$0xff]  ;;  %v747_v45 = vld [vmem:[%s3166_s27 + $0x140] sm:$0xff]  ;;  %772 = vst.msk [vmem:[#allocation2] sm:$0xff] %vm771_vm1, %v707_v44  ;;  %v750_v49 = vld [vmem:[%s3166_s27 + $0x158] sm:$0x1] }
  0x53   : > { %2628 = vmatprep.subr.msk.mxu1 %vm898_vm0, %v3202_v27  ;;  %2606 = vmatmul.mubr.msk.f32.gmra.mrb[2].mxu1 %vm771_vm1, %v3211_v31  ;;  %v1591_v40 = vld [vmem:[#allocation2 + $0x121] sm:$0xff]  ;;  %811 = vst.msk [vmem:[#allocation2 + $0x150] sm:$0xff] %vm771_vm1, %v745_v42  ;;  %813 = vst.msk [vmem:[#allocation2 + $0x160] sm:$0xff] %vm771_vm1, %v747_v45  ;;  %v709_v47 = vld [vmem:[%s3166_s27 + $0x10] sm:$0xff] }
  0x54   : > { %2662 = vmatmul.mubr.msk.f32.gmra.mrb[2].mxu0 %vm771_vm1, %v1444_v32  ;;  %2608 = vmatprep.mubr.msk.f32.mxu1 %vm771_vm1, %v3213_v33  ;;  %v749_v48 = vld [vmem:[%s3166_s27 + $0x150] sm:$0xff]  ;;  %775 = vst.msk [vmem:[#allocation2 + $0x10] sm:$0xff] %vm771_vm1, %v709_v47  ;;  %v711_v50 = vld [vmem:[%s3166_s27 + $0x20] sm:$0xff]  ;;  %v752_v52 = vld [vmem:[%s3166_s27 + $0x168] sm:$0x1] }
  0x55   : > { %2672 = vmatprep.mubr.msk.f32.mxu0 %vm771_vm1, %v1591_v40  ;;  %815 = vst.msk [vmem:[#allocation2 + $0x170] sm:$0xff] %vm771_vm1, %v749_v48  ;;  %v751_v51 = vld [vmem:[%s3166_s27 + $0x160] sm:$0xff]  ;;  %777 = vst.msk [vmem:[#allocation2 + $0x20] sm:$0xff] %vm771_vm1, %v711_v50  ;;  %v713_v53 = vld [vmem:[%s3166_s27 + $0x30] sm:$0xff] }
  0x56   : > { %816 = vst.msk [vmem:[#allocation2 + $0x178] sm:$0x1] %vm773_vm2, %v750_v49  ;;  %v753_v54 = vld [vmem:[%s3166_s27 + $0x170] sm:$0xff]  ;;  %818 = vst.msk [vmem:[#allocation2 + $0x188] sm:$0x1] %vm773_vm2, %v752_v52  ;;  %v715_v56 = vld [vmem:[%s3166_s27 + $0x40] sm:$0xff] }
  0x57   : > { %817 = vst.msk [vmem:[#allocation2 + $0x180] sm:$0xff] %vm771_vm1, %v751_v51  ;;  %779 = vst.msk [vmem:[#allocation2 + $0x30] sm:$0xff] %vm771_vm1, %v713_v53  ;;  %v754_v55 = vld [vmem:[%s3166_s27 + $0x178] sm:$0x1]  ;;  %v3275_v57 = vld [vmem:[%s3451_s2 + $0x1c] sm:$0xf] }
  0x58   : > { %819 = vst.msk [vmem:[#allocation2 + $0x190] sm:$0xff] %vm771_vm1, %v753_v54  ;;  %v3277_v58 = vld [vmem:[#allocation2 + $0xe0] sm:$0xff]  ;;  %v1592_v59 = vld [vmem:[#allocation2 + $0x131] sm:$0xff]  ;;  %781 = vst.msk [vmem:[#allocation2 + $0x40] sm:$0xff] %vm771_vm1, %v715_v56 }
  0x59   : > { %820 = vst.msk [vmem:[#allocation2 + $0x198] sm:$0x1] %vm773_vm2, %v754_v55  ;;  %v717_v60 = vld [vmem:[%s3166_s27 + $0x50] sm:$0xff]  ;;  %2609 = vmatmul.mubr.msk.f32.gmra.mrb[4].mxu1 %vm771_vm1, %v3277_v58  ;;  %2673 = vmatmul.mubr.msk.f32.vlgmr.msra.gmra.mrb[0].mxu0 %vm771_vm1, %v1592_v59  ;;  %v1593_v62 = vld [vmem:[#allocation2 + $0x141] sm:$0xff]  ;;  %v710_v6 = vld [vmem:[%s3166_s27 + $0x18] sm:$0x1] }
  0x5a   : > { %v3285_v61 = vld [vmem:[#allocation2 + $0xf0] sm:$0xff]  ;;  %783 = vst.msk [vmem:[#allocation2 + $0x50] sm:$0xff] %vm771_vm1, %v717_v60  ;;  %v719_v63 = vld [vmem:[%s3166_s27 + $0x60] sm:$0xff]  ;;  %2685 = vmatpush3.msk.msra.mxu0 %vm898_vm0, %v3197_v26  ;;  %v708_v2 = vld [vmem:[%s3166_s27 + $0x8] sm:$0x1]  ;;  %2675 = vmatprep.mubr.msk.f32.mxu0 %vm771_vm1, %v1593_v62 }
  0x5b   : > { %2611 = vmatprep.mubr.msk.f32.mxu1 %vm771_vm1, %v3285_v61  ;;  %v3295_v0 = vld [vmem:[#allocation2 + $0x100] sm:$0xff]  ;;  %785 = vst.msk [vmem:[#allocation2 + $0x60] sm:$0xff] %vm771_vm1, %v719_v63  ;;  %v721_v1 = vld [vmem:[%s3166_s27 + $0x70] sm:$0xff]  ;;  %2698 = vmatprep.subr.msk.mxu0 %vm898_vm0, %v3275_v57  ;;  %v712_v7 = vld [vmem:[%s3166_s27 + $0x28] sm:$0x1] }
  0x5c   : > { %v1594_v3 = vld [vmem:[#allocation2 + $0x151] sm:$0xff]  ;;  %v854_v4 = vld [vmem:[#allocation2] sm:$0xff]  ;;  %787 = vst.msk [vmem:[#allocation2 + $0x70] sm:$0xff] %vm771_vm1, %v721_v1  ;;  %v2456_v13 = vld [vmem:[%s3451_s2 + $0xc] sm:$0xf] }
  0x5d   : > { %774 = vst.msk [vmem:[#allocation2 + $0x8] sm:$0x1] %vm773_vm2, %v708_v2  ;;  %v1595_v5 = vld [vmem:[#allocation2 + $0x161] sm:$0xff]  ;;  %2612 = vmatmul.mubr.msk.f32.gmra.mrb[6].mxu1 %vm771_vm1, %v3295_v0  ;;  %2676 = vmatmul.mubr.msk.f32.gmra.mrb[2].mxu0 %vm771_vm1, %v1594_v3  ;;  %776 = vst.msk [vmem:[#allocation2 + $0x18] sm:$0x1] %vm773_vm2, %v710_v6  ;;  %v855_v8 = vld [vmem:[#allocation2 + $0x10] sm:$0xff] }
  0x5e   : > { %2616 = vmatprep.mubr.msk.f32.mxu1 %vm771_vm1, %v854_v4  ;;  %2678 = vmatprep.mubr.msk.f32.mxu0 %vm771_vm1, %v1595_v5  ;;  %v1596_v10 = vld [vmem:[#allocation2 + $0x171] sm:$0xff]  ;;  %778 = vst.msk [vmem:[#allocation2 + $0x28] sm:$0x1] %vm773_vm2, %v712_v7  ;;  %v856_v12 = vld [vmem:[#allocation2 + $0x20] sm:$0xff]  ;;  %v716_v19 = vld [vmem:[%s3166_s27 + $0x48] sm:$0x1] }
  0x5f   : > { %v714_v11 = vld [vmem:[%s3166_s27 + $0x38] sm:$0x1]  ;;  %v837_v14 = vld [vmem:[%s3319_s9] sm:$0xff]  ;;  %v857_v16 = vld [vmem:[#allocation2 + $0x30] sm:$0xff]  ;;  %782 = vst.msk [vmem:[#allocation2 + $0x48] sm:$0x1] %vm773_vm2, %v716_v19 }
  0x60   : > { %780 = vst.msk [vmem:[#allocation2 + $0x38] sm:$0x1] %vm773_vm2, %v714_v11  ;;  %v1597_v15 = vld [vmem:[#allocation2 + $0x181] sm:$0xff]  ;;  %v1598_v17 = vld [vmem:[#allocation2 + $0x191] sm:$0xff] }
  0x61   : > { %846 = vst.msk [vmem:[#allocation2 + $0x80] sm:$0xff] %vm771_vm1, %v837_v14  ;;  %2617 = vmatmul.mubr.msk.f32.vlgmr.msra.gmra.mrb[0].mxu1 %vm771_vm1, %v855_v8  ;;  %2679 = vmatmul.mubr.msk.f32.gmra.mrb[4].mxu0 %vm771_vm1, %v1596_v10  ;;  %v858_v18 = vld [vmem:[#allocation2 + $0x40] sm:$0xff]  ;;  %v718_v20 = vld [vmem:[%s3166_s27 + $0x58] sm:$0x1]  ;;  %v720_v21 = vld [vmem:[%s3166_s27 + $0x68] sm:$0x1] }
  0x62   : > { %2629 = vmatpush3.msk.msra.mxu1 %vm898_vm0, %v3202_v27  ;;  %2619 = vmatprep.mubr.msk.f32.mxu1 %vm771_vm1, %v856_v12  ;;  %784 = vst.msk [vmem:[#allocation2 + $0x58] sm:$0x1] %vm773_vm2, %v718_v20  ;;  %v722_v22 = vld [vmem:[%s3166_s27 + $0x78] sm:$0x1]  ;;  %786 = vst.msk [vmem:[#allocation2 + $0x68] sm:$0x1] %vm773_vm2, %v720_v21 }
  0x63   : > { %2681 = vmatprep.mubr.msk.f32.mxu0 %vm771_vm1, %v1597_v15  ;;  %2642 = vmatprep.subr.msk.mxu1 %vm898_vm0, %v2456_v13  ;;  %788 = vst.msk [vmem:[#allocation2 + $0x78] sm:$0x1] %vm773_vm2, %v722_v22  ;;  %v859_v23 = vld [vmem:[#allocation2 + $0x50] sm:$0xff]  ;;  %v860_v24 = vld [vmem:[#allocation2 + $0x60] sm:$0xff]  ;;  %v838_v36 = vld [vmem:[%s3319_s9 + $0x8] sm:$0x1] }
  0x64   : > { %v839_v26 = vld [vmem:[%s3319_s9 + $0x10] sm:$0xff]  ;;  %v2506_v27 = vld [vmem:[%s3451_s2 + $0x20] sm:$0xf]  ;;  %847 = vst.msk [vmem:[#allocation2 + $0x88] sm:$0x1] %vm773_vm2, %v838_v36 }
  0x65   : > { %2620 = vmatmul.mubr.msk.f32.gmra.mrb[2].mxu1 %vm771_vm1, %v857_v16  ;;  %2682 = vmatmul.mubr.msk.f32.gmra.mrb[6].mxu0 %vm771_vm1, %v1598_v17  ;;  %848 = vst.msk [vmem:[#allocation2 + $0x110] sm:$0xff] %vm771_vm1, %v839_v26  ;;  %v763_v28 = vld [vmem:[%s3166_s27 + $0x1c0] sm:$0xff]  ;;  %v765_v30 = vld [vmem:[%s3166_s27 + $0x1d0] sm:$0xff] }
  0x66   : > { %2622 = vmatprep.mubr.msk.f32.mxu1 %vm771_vm1, %v858_v18  ;;  %2686 = vmatprep.mubr.msk.f32.mxu0 %vm771_vm1, %v855_v8  ;;  %v767_v32 = vld [vmem:[%s3166_s27 + $0x1e0] sm:$0xff]  ;;  %v861_v34 = vld [vmem:[#allocation2 + $0x70] sm:$0xff]  ;;  %829 = vst.msk [vmem:[#allocation2 + $0x1f0] sm:$0xff] %vm771_vm1, %v763_v28  ;;  %831 = vst.msk [vmem:[#allocation2 + $0x200] sm:$0xff] %vm771_vm1, %v765_v30 }
  0x67   : > { %833 = vst.msk [vmem:[#allocation2 + $0x210] sm:$0xff] %vm771_vm1, %v767_v32  ;;  %v769_v35 = vld [vmem:[%s3166_s27 + $0x1f0] sm:$0xff]  ;;  %v1139_v37 = vld [vmem:[#allocation2 + $0x1] sm:$0xff] }
  0x68   : > { %835 = vst.msk [vmem:[#allocation2 + $0x220] sm:$0xff] %vm771_vm1, %v769_v35  ;;  %v1140_v38 = vld [vmem:[#allocation2 + $0x11] sm:$0xff]  ;;  %v1141_v39 = vld [vmem:[#allocation2 + $0x21] sm:$0xff] }
  0x69   : > { %2623 = vmatmul.mubr.msk.f32.gmra.mrb[4].mxu1 %vm771_vm1, %v859_v23  ;;  %2687 = vmatmul.mubr.msk.f32.vlgmr.msra.gmra.mrb[0].mxu0 %vm771_vm1, %v856_v12  ;;  %v1142_v40 = vld [vmem:[#allocation2 + $0x31] sm:$0xff]  ;;  %v1749_v41 = vld [vmem:[#allocation2 + $0x80] sm:$0xff] }
  0x6a   : > { %2699 = vmatpush3.msk.msra.mxu0 %vm898_vm0, %v3275_v57  ;;  %2625 = vmatprep.mubr.msk.f32.mxu1 %vm771_vm1, %v860_v24  ;;  %v1143_v42 = vld [vmem:[#allocation2 + $0x41] sm:$0xff]  ;;  %v1144_v43 = vld [vmem:[#allocation2 + $0x51] sm:$0xff] }
  0x6b   : > { %2689 = vmatprep.mubr.msk.f32.mxu0 %vm771_vm1, %v857_v16  ;;  %2712 = vmatprep.subr.msk.mxu0 %vm898_vm0, %v2506_v27  ;;  %v1145_v44 = vld [vmem:[#allocation2 + $0x61] sm:$0xff]  ;;  %v1146_v45 = vld [vmem:[#allocation2 + $0x71] sm:$0xff] }
  0x6c   : > { %v1290_v46 = vld [vmem:[#allocation2 + $0x120] sm:$0xff]  ;;  %v1900_v47 = vld [vmem:[#allocation2 + $0x110] sm:$0xff] }
  0x6d   : > { %2626 = vmatmul.mubr.msk.f32.gmra.mrb[6].mxu1 %vm771_vm1, %v861_v34  ;;  %2690 = vmatmul.mubr.msk.f32.gmra.mrb[2].mxu0 %vm771_vm1, %v858_v18  ;;  %v1295_v48 = vld [vmem:[#allocation2 + $0x170] sm:$0xff]  ;;  %v1296_v49 = vld [vmem:[#allocation2 + $0x180] sm:$0xff] }
  0x6e   : > { %2630 = vmatprep.mubr.msk.f32.mxu1 %vm771_vm1, %v1139_v37  ;;  %2692 = vmatprep.mubr.msk.f32.mxu0 %vm771_vm1, %v859_v23  ;;  %v1445_v50 = vld [vmem:[#allocation2 + $0x1f0] sm:$0xff]  ;;  %v1446_v51 = vld [vmem:[#allocation2 + $0x200] sm:$0xff] }
  0x6f   : > { %v1447_v52 = vld [vmem:[#allocation2 + $0x210] sm:$0xff]  ;;  %v1448_v53 = vld [vmem:[#allocation2 + $0x220] sm:$0xff] }
  0x70   : > { %v2050_v54 = vld [vmem:[#allocation2 + $0x81] sm:$0xff] }
  0x71   : > { %2631 = vmatmul.mubr.msk.f32.vlgmr.msra.gmra.mrb[0].mxu1 %vm771_vm1, %v1140_v38  ;;  %2693 = vmatmul.mubr.msk.f32.gmra.mrb[4].mxu0 %vm771_vm1, %v860_v24 }
  0x72   : > { %2643 = vmatpush3.msk.msra.mxu1 %vm898_vm0, %v2456_v13  ;;  %2633 = vmatprep.mubr.msk.f32.mxu1 %vm771_vm1, %v1141_v39 }
  0x73   : > { %2695 = vmatprep.mubr.msk.f32.mxu0 %vm771_vm1, %v861_v34  ;;  %2726 = vmatprep.subr.msk.mxu1 %vm898_vm0, %v3149_v9 }
  0x75   : > { %2634 = vmatmul.mubr.msk.f32.gmra.mrb[2].mxu1 %vm771_vm1, %v1142_v40  ;;  %2696 = vmatmul.mubr.msk.f32.gmra.mrb[6].mxu0 %vm771_vm1, %v1749_v41 }
  0x76   : > { %2636 = vmatprep.mubr.msk.f32.mxu1 %vm771_vm1, %v1143_v42  ;;  %2700 = vmatprep.mubr.msk.f32.mxu0 %vm771_vm1, %v3192_v25  ;;  %v1291_v25 = vld [vmem:[#allocation2 + $0x130] sm:$0xff] }
  0x79   : > { %2637 = vmatmul.mubr.msk.f32.gmra.mrb[4].mxu1 %vm771_vm1, %v1144_v43  ;;  %2701 = vmatmul.mubr.msk.f32.vlgmr.msra.gmra.mrb[0].mxu0 %vm771_vm1, %v3206_v29  ;;  %v1292_v29 = vld [vmem:[#allocation2 + $0x140] sm:$0xff] }
  0x7a   : > { %2713 = vmatpush3.msk.msra.mxu0 %vm898_vm0, %v2506_v27  ;;  %2639 = vmatprep.mubr.msk.f32.mxu1 %vm771_vm1, %v1145_v44 }
  0x7b   : > { %2703 = vmatprep.mubr.msk.f32.mxu0 %vm771_vm1, %v3211_v31  ;;  %v1293_v31 = vld [vmem:[#allocation2 + $0x150] sm:$0xff] }
  0x7d   : > { %2640 = vmatmul.mubr.msk.f32.gmra.mrb[6].mxu1 %vm771_vm1, %v1146_v45  ;;  %2704 = vmatmul.mubr.msk.f32.gmra.mrb[2].mxu0 %vm771_vm1, %v3213_v33  ;;  %v1294_v33 = vld [vmem:[#allocation2 + $0x160] sm:$0xff] }
  0x7e   : > { %2644 = vmatprep.mubr.msk.f32.mxu1 %vm771_vm1, %v1290_v46  ;;  %2706 = vmatprep.mubr.msk.f32.mxu0 %vm771_vm1, %v3277_v58 }
  0x81   : > { %2645 = vmatmul.mubr.msk.f32.vlgmr.msra.gmra.mrb[0].mxu1 %vm771_vm1, %v1291_v25  ;;  %2707 = vmatmul.mubr.msk.f32.gmra.mrb[4].mxu0 %vm771_vm1, %v3285_v61 }
  0x82   : > { %2727 = vmatpush3.msk.msra.mxu1 %vm898_vm0, %v3149_v9  ;;  %2647 = vmatprep.mubr.msk.f32.mxu1 %vm771_vm1, %v1292_v29  ;;  %v1297_v9 = vld [vmem:[#allocation2 + $0x190] sm:$0xff] }
  0x83   : > { %2709 = vmatprep.mubr.msk.f32.mxu0 %vm771_vm1, %v3295_v0 }
  0x85   : > { %2648 = vmatmul.mubr.msk.f32.gmra.mrb[2].mxu1 %vm771_vm1, %v1293_v31  ;;  %2710 = vmatmul.mubr.msk.f32.gmra.mrb[6].mxu0 %vm771_vm1, %v1900_v47 }
  0x86   : > { %2650 = vmatprep.mubr.msk.f32.mxu1 %vm771_vm1, %v1294_v33  ;;  %2714 = vmatprep.mubr.msk.f32.mxu0 %vm771_vm1, %v1140_v38 }
  0x89   : > { %2651 = vmatmul.mubr.msk.f32.gmra.mrb[4].mxu1 %vm771_vm1, %v1295_v48  ;;  %2715 = vmatmul.mubr.msk.f32.vlgmr.msra.gmra.mrb[0].mxu0 %vm771_vm1, %v1141_v39 }
  0x8a   : > { %2653 = vmatprep.mubr.msk.f32.mxu1 %vm771_vm1, %v1296_v49  ;;  %2717 = vmatprep.mubr.msk.f32.mxu0 %vm771_vm1, %v1142_v40 }
  0x8d   : > { %2654 = vmatmul.mubr.msk.f32.gmra.mrb[6].mxu1 %vm771_vm1, %v1297_v9  ;;  %2718 = vmatmul.mubr.msk.f32.gmra.mrb[2].mxu0 %vm771_vm1, %v1143_v42 }
  0x8e   : > { %2664 = vmatprep.mubr.msk.f32.mxu1 %vm771_vm1, %v1445_v50  ;;  %2720 = vmatprep.mubr.msk.f32.mxu0 %vm771_vm1, %v1144_v43 }
  0x91   : > { %2665 = vmatmul.mubr.msk.f32.vlgmr.msra.gmra.mrb[4].mxu1 %vm771_vm1, %v1446_v51  ;;  %2721 = vmatmul.mubr.msk.f32.gmra.mrb[4].mxu0 %vm771_vm1, %v1145_v44 }
  0x92   : > { %2667 = vmatprep.mubr.msk.f32.mxu1 %vm771_vm1, %v1447_v52  ;;  %2723 = vmatprep.mubr.msk.f32.mxu0 %vm771_vm1, %v1146_v45 }
  0x95   : > { %2668 = vmatmul.mubr.msk.f32.gmra.mrb[6].mxu1 %vm771_vm1, %v1448_v53  ;;  %2724 = vmatmul.mubr.msk.f32.gmra.mrb[6].mxu0 %vm771_vm1, %v2050_v54 }
 0x154   : > { %v2646_v55 = vpop.f32.mrb[0].mxu1 }
 0x155   : > { %v1393_v56 = vpop.f32.mrb[1].mxu1 }
 0x158   : > { %v2649_v57 = vpop.f32.mrb[2].mxu1 }
 0x159   : > { %v1403_v58 = vpop.f32.mrb[3].mxu1 }
 0x15c   : > { %v2716_v59 = vpop.f32.mrb[0].mxu0 }
 0x15d   : > { %v2728_v60 = vadd.f32 %v2716_v59, %v2646_v55  ;;  %v2146_v61 = vpop.f32.mrb[1].mxu0 }
 0x15e   : > { %v2729_v62 = vadd.f32 %v2146_v61, %v1393_v56 }
 0x15f   : > { %v2194_v63 = vmax.f32 %v2728_v60, 0.0 }
 0x160   : > { %v2193_v0 = vmax.f32 %v2729_v62, 0.0  ;;  %v2719_v1 = vpop.f32.mrb[2].mxu0 }
 0x161   : > { %2202 = vst [vmem:[%s3424_s22 + $0x8] sm:$0xff] %v2194_v63  ;;  %v2730_v2 = vadd.f32 %v2719_v1, %v2649_v57  ;;  %v2156_v3 = vpop.f32.mrb[3].mxu0 }
 0x162   : > { %2201 = vst [vmem:[%s3424_s22] sm:$0xff] %v2193_v0  ;;  %v2731_v4 = vadd.f32 %v2156_v3, %v1403_v58 }
 0x163   : > { %v2196_v5 = vmax.f32 %v2730_v2, 0.0 }
 0x164   : > { %v2195_v6 = vmax.f32 %v2731_v4, 0.0  ;;  %v2666_v7 = vpop.f32.mrb[4].mxu1  ;;  %v2722_v8 = vpop.f32.mrb[4].mxu0 }
 0x165   : > { %2204 = vst [vmem:[%s3424_s22 + $0x18] sm:$0xff] %v2196_v5  ;;  %v2732_v10 = vadd.f32 %v2722_v8, %v2666_v7  ;;  %v1564_v11 = vpop.f32.mrb[5].mxu1  ;;  %v2166_v12 = vpop.f32.mrb[5].mxu0 }
 0x166   : > { %2203 = vst [vmem:[%s3424_s22 + $0x10] sm:$0xff] %v2195_v6  ;;  %v2733_v13 = vadd.f32 %v2166_v12, %v1564_v11 }
 0x167   : > { %v2198_v14 = vmax.f32 %v2732_v10, 0.0 }
 0x168   : > { %v2197_v15 = vmax.f32 %v2733_v13, 0.0  ;;  %v2669_v16 = vpop.f32.mrb[6].mxu1  ;;  %v2725_v17 = vpop.f32.mrb[6].mxu0 }
 0x169   : > { %2206 = vst [vmem:[%s3424_s22 + $0x28] sm:$0xff] %v2198_v14  ;;  %v2734_v18 = vadd.f32 %v2725_v17, %v2669_v16  ;;  %v1574_v19 = vpop.f32.mrb[7].mxu1  ;;  %v2176_v20 = vpop.f32.mrb[7].mxu0 }
 0x16a   : > { %2205 = vst [vmem:[%s3424_s22 + $0x20] sm:$0xff] %v2197_v15  ;;  %v2735_v21 = vadd.f32 %v2176_v20, %v1574_v19 }
 0x16b   : > { %v2200_v22 = vmax.f32 %v2734_v18, 0.0 }
 0x16c   : > { %v2199_v23 = vmax.f32 %v2735_v21, 0.0 }
 0x16d   : > { %2208 = vst [vmem:[%s3424_s22 + $0x38] sm:$0xff] %v2200_v22 }
 0x16e   : > { %2207 = vst [vmem:[%s3424_s22 + $0x30] sm:$0xff] %v2199_v23 }
 0x16f PF: > { %s13_s16 = sadd.s32 1, %s2919_s16   ;;  %s3454_s12 = smov %s2907_s13 }
 0x170   : > { %p10_p11 = scmp.ge.s32.totalorder %s13_s16, 4   ;;  %s3455_s13 = smov %s2984_s21 }
 0x171   : > { %s3456_s14 = smov %s2915_s15  ;;  %s3457_s15 = smov %s3459_s17 }
 0x172   :  { %12 = sbr.rel (!%p10_p11) target bundleno = 3 (0x3), region = 212 }

</bundles_post_ra>
